<compile_context>
chip_gen: v7x
topology: tpu7x:2x2x1
jax: 0.10.0
libtpu: 0.0.40
codegen_flags: <defaults>
</compile_context>

<pallas_src>
import functools

import jax
import jax.numpy as jnp
from jax.experimental import pallas as pl
from jax.experimental.pallas import tpu as pltpu

_LANE = 128
_MAX_CHUNKS = 128        # static chunk-unroll cap per grid step (bounded code size)
_ACC_BYTES = 48 << 10    # per-accumulator live bytes (keep it vreg-resident)


def _minmax_kernel(x_ref, min_ref, max_ref, accmin_ref, accmax_ref, *,
                   f_total, tf, cw, lo, hi, has_tail, nk_total):
    s = pl.program_id(1)               # feature split   (parallel)
    k = pl.program_id(2)               # feature tile    (arbitrary / reduction)
    nk = pl.num_programs(2)
    tr = accmin_ref.shape[0]
    n_chunks = tf // cw
    last_base = (nk_total - 1) * tf    # static column offset of the last tile

    @pl.when(k == 0)
    def _init():
        accmin_ref[...] = jnp.full(accmin_ref.shape, hi, accmin_ref.dtype)
        accmax_ref[...] = jnp.full(accmax_ref.shape, lo, accmax_ref.dtype)

    def run_bulk():
        mn = accmin_ref[...]
        mx = accmax_ref[...]
        for c in range(n_chunks):
            chunk = x_ref[:, c * cw:(c + 1) * cw]
            mn = jnp.minimum(mn, chunk)
            mx = jnp.maximum(mx, chunk)
        accmin_ref[...] = mn
        accmax_ref[...] = mx

    def run_tail():
        # Globally-last feature tile.  Chunk offsets vs f_total are static:
        # fully-valid chunks stay unmasked, wholly out-of-bounds chunks are
        # skipped, and at most one straddling chunk pays the lane mask.
        mn = accmin_ref[...]
        mx = accmax_ref[...]
        for c in range(n_chunks):
            col0 = last_base + c * cw
            if col0 >= f_total:
                break
            chunk = x_ref[:, c * cw:(c + 1) * cw]
            if col0 + cw <= f_total:
                mn = jnp.minimum(mn, chunk)
                mx = jnp.maximum(mx, chunk)
            else:
                lane = jax.lax.broadcasted_iota(jnp.int32, (tr, cw), 1)
                valid = (col0 + lane) < f_total
                mn = jnp.minimum(mn, jnp.where(valid, chunk, hi))
                mx = jnp.maximum(mx, jnp.where(valid, chunk, lo))
        accmin_ref[...] = mn
        accmax_ref[...] = mx

    if not has_tail:
        run_bulk()
    elif nk_total == 1:
        run_tail()
    else:
        is_last = (s == pl.num_programs(1) - 1) & (k == nk - 1)

        @pl.when(jnp.logical_not(is_last))
        def _bulk():
            run_bulk()

        @pl.when(is_last)
        def _tail():
            run_tail()

    @pl.when(k == nk - 1)
    def _finalize():
        mn = jnp.min(accmin_ref[...], axis=-1, keepdims=True)
        mx = jnp.max(accmax_ref[...], axis=-1, keepdims=True)
        min_ref[...] = jnp.broadcast_to(mn, min_ref.shape)
        max_ref[...] = jnp.broadcast_to(mx, max_ref.shape)


def _sentinels(dtype):
    if jnp.issubdtype(dtype, jnp.floating):
        return float("-inf"), float("inf")
    info = jnp.iinfo(dtype)
    return int(info.min), int(info.max)


def _round_up(v, m):
    return -(-v // m) * m


def _per_buffer_budget_bytes():
    # One in-flight input tile <= min(4 MiB, VMEM/16): the double-buffered
    # input plus scratch stays inside every generation's scoped limit
    # (16 MiB v5e default, 32 MiB v6e/v7x) and v7x's 64 MiB physical VMEM.
    try:
        cap = int(pltpu.get_tpu_info().vmem_capacity_bytes)
    except Exception:
        cap = 64 << 20
    return max(1 << 20, min(4 << 20, cap // 16))


def _choose_row_block(nrows, itemsize):
    # Packed-sublane row granularity: 8 rows (f32), 16 (bf16), 32 (int8).
    sub = 8 * max(1, 4 // max(1, itemsize))
    if nrows < sub:
        return nrows                       # full-dim block (allowed)
    # Cap at 64 rows so the (tr, cw) accumulators stay vreg-resident and
    # prefer >= 2 row blocks (lets the row axis shard across TensorCores).
    tr = min(64, (nrows // 2 // sub) * sub)
    return tr if tr >= sub else sub


def _choose_chunk_width(tr, itemsize, feat):
    # Lane width of the running accumulators: keep each (tr, cw) accumulator
    # under ~48 KiB so both stay resident in the 64 x 4 KiB vreg file.
    f_pad = _round_up(feat, _LANE)
    cw = 512
    while cw > _LANE and (tr * cw * itemsize > _ACC_BYTES or cw > f_pad):
        cw //= 2
    return cw


def _choose_global_rows(total):
    # Sublane-dense reshape for the global path: multiple-of-8 rows dividing
    # the element count with at least one full lane group per row.
    for cand in (512, 256, 128, 64, 32, 16, 8):
        if total % cand == 0 and total // cand >= _LANE:
            return cand
    return 1


def _balanced_tiles(feat, tf_max, cw, n_splits):
    """Feature tile width tf (multiple of cw, <= tf_max) and tile count
    nk_total (multiple of n_splits) with cdiv(feat, tf) == nk_total, i.e.
    near-equal tiles and no wholly out-of-bounds edge tile."""
    nk_min = int(pl.cdiv(feat, tf_max))
    nk0 = _round_up(max(nk_min, n_splits), n_splits)
    for nk in range(nk0, nk0 + 8 * n_splits + 1, n_splits):
        tf = _round_up(int(pl.cdiv(feat, nk)), cw)
        if tf <= tf_max and int(pl.cdiv(feat, tf)) == nk:
            return tf, nk
    return None, None


@jax.jit
def _rowwise_minmax(x2d):
    """x2d: (R, F) -> (min (R,), max (R,)) reduced over the feature axis."""
    R, F = x2d.shape
    dtype = x2d.dtype
    itemsize = jnp.dtype(dtype).itemsize
    lo, hi = _sentinels(dtype)

    tr = _choose_row_block(R, itemsize)
    n_row_blocks = int(pl.cdiv(R, tr))
    cw = _choose_chunk_width(tr, itemsize, F)

    budget_tf = (_per_buffer_budget_bytes() // (tr * itemsize)) // cw * cw
    tf_max = max(cw, min(budget_tf, _MAX_CHUNKS * cw))

    # Split the feature reduction across two parallel grid cells when there is
    # a single row block, so both TensorCores stream HBM on v7x.
    n_splits, tf, nk_total = 1, None, None
    if n_row_blocks == 1:
        tf2, nk2 = _balanced_tiles(F, tf_max, cw, 2)
        if tf2 is not None:
            n_splits, tf, nk_total = 2, tf2, nk2
    if tf is None:
        tf, nk_total = _balanced_tiles(F, tf_max, cw, 1)
        if tf is None:                       # unreachable fallback, kept safe
            tf = min(tf_max, _round_up(F, cw))
            nk_total = int(pl.cdiv(F, tf))
    nk_per = nk_total // n_splits
    has_tail = nk_total * tf > F

    kernel = functools.partial(
        _minmax_kernel, f_total=F, tf=tf, cw=cw, lo=lo, hi=hi,
        has_tail=has_tail, nk_total=nk_total)

    # Explicit VMEM limit (double-buffered input + scratch + outputs + slack);
    # stays under v5e's 16 MiB default scoped limit by construction.
    vmem_limit = int(2 * tr * tf * itemsize + 2 * tr * cw * itemsize
                     + 4 * tr * _LANE * itemsize) + (2 << 20)
    vmem_limit = max(vmem_limit, 16 << 20)

    out_shape = jax.ShapeDtypeStruct((R, n_splits * _LANE), dtype)
    xmin, xmax = pl.pallas_call(
        kernel,
        out_shape=(out_shape, out_shape),
        grid_spec=pltpu.PrefetchScalarGridSpec(
            num_scalar_prefetch=0,
            grid=(n_row_blocks, n_splits, nk_per),
            in_specs=[pl.BlockSpec((tr, tf),
                                   lambda i, s, k: (i, s * nk_per + k))],
            out_specs=[
                pl.BlockSpec((tr, _LANE), lambda i, s, k: (i, s)),
                pl.BlockSpec((tr, _LANE), lambda i, s, k: (i, s)),
            ],
            scratch_shapes=[
                pltpu.VMEM((tr, cw), dtype),
                pltpu.VMEM((tr, cw), dtype),
            ],
        ),
        compiler_params=pltpu.CompilerParams(
            dimension_semantics=("parallel", "parallel", "arbitrary"),
            vmem_limit_bytes=vmem_limit),
    )(x2d)

    # Lane 0 of each (row block, split) output block holds the partial result.
    xmin = jnp.min(xmin.reshape(R, n_splits, _LANE)[:, :, 0], axis=-1)
    xmax = jnp.max(xmax.reshape(R, n_splits, _LANE)[:, :, 0], axis=-1)
    return xmin, xmax


class RunningMinMaxEstimator:
    """JAX/Pallas port of aihwkit's RunningMinMaxEstimator (forward pass)."""

    def __init__(self, momentum=0.9, per_channel=False, quantizer=None,
                 axis=None, n_groups=None):
        self.momentum = momentum
        self.per_channel = per_channel
        self.quantizer = quantizer
        self.axis = axis
        self.n_groups = n_groups
        self.current_xmin = None
        self.current_xmax = None
        # TODO(synk): nn.Module buffer registration / _load_from_state_dict
        # have no Pallas equivalent; state is kept as plain Python attributes.

    def reset(self):
        self.current_xmin = None
        self.current_xmax = None

    def forward(self, x):
        if self.axis is not None:
            if self.axis != 0:
                x = jnp.swapaxes(x, 0, self.axis)
            x2d = x.reshape(x.shape[0], -1)
            if self.n_groups is not None:
                ng = self.n_groups
                assert ng > 0 and x2d.shape[0] % ng == 0
                gs = x2d.shape[0] // ng
                gmin, gmax = _rowwise_minmax(x2d.reshape(ng, -1))
                x_min = jnp.repeat(gmin, gs)
                x_max = jnp.repeat(gmax, gs)
            else:
                x_min, x_max = _rowwise_minmax(x2d)
        elif self.per_channel:
            x_min, x_max = _rowwise_minmax(x.reshape(x.shape[0], -1))
        else:
            total = x.size
            rows = _choose_global_rows(total)
            rmin, rmax = _rowwise_minmax(x.reshape(rows, total // rows))
            x_min = jnp.min(rmin)
            x_max = jnp.max(rmax)

        if self.current_xmin is None:
            self.current_xmin = x_min
            self.current_xmax = x_max
        else:
            m = self.momentum
            self.current_xmin = (1 - m) * x_min + m * self.current_xmin
            self.current_xmax = (1 - m) * x_max + m * self.current_xmax
        return self.current_xmin, self.current_xmax

    __call__ = forward


if __name__ == "__main__":
    key = jax.random.PRNGKey(0)
    k1, k2, k3, k4 = jax.random.split(key, 4)

    # NCHW inputs, small shapes.
    x1 = jax.random.normal(k1, (2, 4, 16, 16), dtype=jnp.float32)
    x2 = jax.random.normal(k2, (2, 4, 16, 16), dtype=jnp.float32) * 2.0
    m = 0.9

    # ---- global (per_channel=False) path with running EMA update ----
    est_g = RunningMinMaxEstimator(momentum=m, per_channel=False)
    est_g(x1)
    gmin2, gmax2 = est_g(x2)
    jax.block_until_ready((gmin2, gmax2))
    ref_min = (1 - m) * jnp.min(x2) + m * jnp.min(x1)
    ref_max = (1 - m) * jnp.max(x2) + m * jnp.max(x1)
    assert gmin2.shape == () and gmax2.shape == ()
    assert jnp.allclose(gmin2, ref_min) and jnp.allclose(gmax2, ref_max)

    # ---- per-channel (dim 0) path (single row block -> parallel split) ----
    est_pc = RunningMinMaxEstimator(momentum=m, per_channel=True)
    est_pc(x1)
    cmin2, cmax2 = est_pc(x2)
    jax.block_until_ready((cmin2, cmax2))
    r1 = x1.reshape(x1.shape[0], -1)
    r2 = x2.reshape(x2.shape[0], -1)
    ref_cmin = (1 - m) * r2.min(axis=-1) + m * r1.min(axis=-1)
    ref_cmax = (1 - m) * r2.max(axis=-1) + m * r1.max(axis=-1)
    assert cmin2.shape == (x1.shape[0],)
    assert jnp.allclose(cmin2, ref_cmin) and jnp.allclose(cmax2, ref_cmax)

    # ---- axis + n_groups path ----
    est_ax = RunningMinMaxEstimator(momentum=m, axis=1, n_groups=2)
    amin, amax = est_ax(x1)
    jax.block_until_ready((amin, amax))
    xt = jnp.swapaxes(x1, 0, 1).reshape(4, -1).reshape(2, -1)
    ref_am = jnp.repeat(xt.min(axis=-1), 2)
    ref_aM = jnp.repeat(xt.max(axis=-1), 2)
    assert amin.shape == (4,)
    assert jnp.allclose(amin, ref_am) and jnp.allclose(amax, ref_aM)

    # ---- awkward feature length: single tile with a masked tail ----
    x3 = jax.random.normal(k3, (3, 5, 7, 11), dtype=jnp.float32)
    f3 = x3.reshape(3, -1)
    m3, M3 = _rowwise_minmax(f3)
    jax.block_until_ready((m3, M3))
    assert jnp.allclose(m3, f3.min(axis=-1)) and jnp.allclose(M3, f3.max(axis=-1))

    # ---- split feature axis + non-multiple length (bulk + masked tail tile) --
    f4 = jax.random.normal(k4, (2, 1500), dtype=jnp.float32)
    m4, M4 = _rowwise_minmax(f4)
    jax.block_until_ready((m4, M4))
    assert jnp.allclose(m4, f4.min(axis=-1)) and jnp.allclose(M4, f4.max(axis=-1))

    print("KERNEL_OK")
</pallas_src>

<mosaic_0001>
module attributes {stable_mosaic.version = 11 : i64} {
  func.func @_minmax_kernel(%arg0: i32, %arg1: i32, %arg2: i32, %arg3: memref<8x128xf32, #tpu.memory_space<vmem>>, %arg4: memref<8x128xf32, #tpu.memory_space<vmem>>, %arg5: memref<8x128xf32, #tpu.memory_space<vmem>>, %arg6: memref<8x128xf32, #tpu.memory_space<vmem>>, %arg7: memref<8x128xf32, #tpu.memory_space<vmem>>) attributes {dimension_semantics = [#tpu.dimension_semantics<parallel>, #tpu.dimension_semantics<parallel>, #tpu.dimension_semantics<arbitrary>], iteration_bounds = array<i64: 2, 1, 1>, scalar_prefetch = 0 : i64, scratch_operands = 2 : i64, tpu.core_type = #tpu.core_type<tc>, window_params = [{transform_indices = @transform_0, window_bounds = array<i64: 8, 128>}, {transform_indices = @transform_1, window_bounds = array<i64: 8, 128>}, {transform_indices = @transform_2, window_bounds = array<i64: 8, 128>}]} {
    %c0_i32 = arith.constant 0 : i32
    %0 = arith.cmpi eq, %arg2, %c0_i32 : i32
    %1 = arith.extui %0 : i1 to i32
    %c0_i32_0 = arith.constant 0 : i32
    %2 = arith.cmpi ne, %1, %c0_i32_0 : i32
    scf.if %2 {
      %cst = arith.constant 0x7F800000 : f32
      %13 = vector.broadcast %cst : f32 to vector<8x128xf32>
      %c0_12 = arith.constant 0 : index
      %c0_13 = arith.constant 0 : index
      %14 = vector.load %arg6[%c0_12, %c0_13] : memref<8x128xf32, #tpu.memory_space<vmem>>, vector<8x128xf32>
      tpu.vector_store %arg6[%c0_12, %c0_13], %13 {strides = array<i32>} : memref<8x128xf32, #tpu.memory_space<vmem>>, vector<8x128xf32>,
      %cst_14 = arith.constant 0xFF800000 : f32
      %15 = vector.broadcast %cst_14 : f32 to vector<8x128xf32>
      %c0_15 = arith.constant 0 : index
      %c0_16 = arith.constant 0 : index
      %16 = vector.load %arg7[%c0_15, %c0_16] : memref<8x128xf32, #tpu.memory_space<vmem>>, vector<8x128xf32>
      tpu.vector_store %arg7[%c0_15, %c0_16], %15 {strides = array<i32>} : memref<8x128xf32, #tpu.memory_space<vmem>>, vector<8x128xf32>,
    } else {
    }
    %c0 = arith.constant 0 : index
    %c0_1 = arith.constant 0 : index
    %3 = vector.load %arg6[%c0, %c0_1] : memref<8x128xf32, #tpu.memory_space<vmem>>, vector<8x128xf32>
    %c0_2 = arith.constant 0 : index
    %c0_3 = arith.constant 0 : index
    %4 = vector.load %arg7[%c0_2, %c0_3] : memref<8x128xf32, #tpu.memory_space<vmem>>, vector<8x128xf32>
    %c0_4 = arith.constant 0 : index
    %c0_5 = arith.constant 0 : index
    %5 = vector.load %arg3[%c0_4, %c0_5] : memref<8x128xf32, #tpu.memory_space<vmem>>, vector<8x128xf32>
    %6 = arith.minimumf %3, %5 : vector<8x128xf32>
    %7 = arith.maximumf %4, %5 : vector<8x128xf32>
    %c0_6 = arith.constant 0 : index
    %c0_7 = arith.constant 0 : index
    %8 = vector.load %arg6[%c0_6, %c0_7] : memref<8x128xf32, #tpu.memory_space<vmem>>, vector<8x128xf32>
    tpu.vector_store %arg6[%c0_6, %c0_7], %6 {strides = array<i32>} : memref<8x128xf32, #tpu.memory_space<vmem>>, vector<8x128xf32>,
    %c0_8 = arith.constant 0 : index
    %c0_9 = arith.constant 0 : index
    %9 = vector.load %arg7[%c0_8, %c0_9] : memref<8x128xf32, #tpu.memory_space<vmem>>, vector<8x128xf32>
    tpu.vector_store %arg7[%c0_8, %c0_9], %7 {strides = array<i32>} : memref<8x128xf32, #tpu.memory_space<vmem>>, vector<8x128xf32>,
    %c0_i32_10 = arith.constant 0 : i32
    %10 = arith.cmpi eq, %arg2, %c0_i32_10 : i32
    %11 = arith.extui %10 : i1 to i32
    %c0_i32_11 = arith.constant 0 : i32
    %12 = arith.cmpi ne, %11, %c0_i32_11 : i32
    scf.if %12 {
      %c0_12 = arith.constant 0 : index
      %c0_13 = arith.constant 0 : index
      %13 = vector.load %arg6[%c0_12, %c0_13] : memref<8x128xf32, #tpu.memory_space<vmem>>, vector<8x128xf32>
      %cst = arith.constant dense<0x7F800000> : vector<8xf32>
      %14 = vector.multi_reduction <minimumf>, %13, %cst [1] : vector<8x128xf32> to vector<8xf32>
      %15 = vector.shape_cast %14 : vector<8xf32> to vector<8x1xf32>
      %c0_14 = arith.constant 0 : index
      %c0_15 = arith.constant 0 : index
      %16 = vector.load %arg7[%c0_14, %c0_15] : memref<8x128xf32, #tpu.memory_space<vmem>>, vector<8x128xf32>
      %cst_16 = arith.constant dense<0xFF800000> : vector<8xf32>
      %17 = vector.multi_reduction <maximumf>, %16, %cst_16 [1] : vector<8x128xf32> to vector<8xf32>
      %18 = vector.shape_cast %17 : vector<8xf32> to vector<8x1xf32>
      %19 = vector.shape_cast %15 : vector<8x1xf32> to vector<8x1xf32>
      %20 = vector.broadcast %19 : vector<8x1xf32> to vector<8x128xf32>
      %c0_17 = arith.constant 0 : index
      %c0_18 = arith.constant 0 : index
      %21 = vector.load %arg4[%c0_17, %c0_18] : memref<8x128xf32, #tpu.memory_space<vmem>>, vector<8x128xf32>
      tpu.vector_store %arg4[%c0_17, %c0_18], %20 {strides = array<i32>} : memref<8x128xf32, #tpu.memory_space<vmem>>, vector<8x128xf32>,
      %22 = vector.shape_cast %18 : vector<8x1xf32> to vector<8x1xf32>
      %23 = vector.broadcast %22 : vector<8x1xf32> to vector<8x128xf32>
      %c0_19 = arith.constant 0 : index
      %c0_20 = arith.constant 0 : index
      %24 = vector.load %arg5[%c0_19, %c0_20] : memref<8x128xf32, #tpu.memory_space<vmem>>, vector<8x128xf32>
      tpu.vector_store %arg5[%c0_19, %c0_20], %23 {strides = array<i32>} : memref<8x128xf32, #tpu.memory_space<vmem>>, vector<8x128xf32>,
    } else {
    }
    return
  }
  func.func @transform_0(%arg0: i32, %arg1: i32, %arg2: i32) -> (i32, i32) {
    %c1_i32 = arith.constant 1 : i32
    %0 = arith.muli %arg1, %c1_i32 : i32
    %1 = arith.addi %0, %arg2 : i32
    %c0_i32 = arith.constant 0 : i32
    return %arg0, %1 : i32, i32
  }
  func.func @transform_1(%arg0: i32, %arg1: i32, %arg2: i32) -> (i32, i32) {
    %c0_i32 = arith.constant 0 : i32
    return %arg0, %arg1 : i32, i32
  }
  func.func @transform_2(%arg0: i32, %arg1: i32, %arg2: i32) -> (i32, i32) {
    %c0_i32 = arith.constant 0 : i32
    return %arg0, %arg1 : i32, i32
  }
}

</mosaic_0001>

<bundles_post_ra>
// kernel: _rowwise_minmax.1
= control target key start
LH: loop header
LB: loop body
LE: loop exit
PB: predicated region body
PF: predicated region fallthrough
CT: control target
= control target key end

     0   :  { %8 = vsyncpa [#allocation5], 0  ;;  %s658_s0 = inlined_call_operand.hbm [shape: f32[16,128], index: 0, kind: input, shape index: {}]   ;;  %s659_s1 = inlined_call_operand.vmem [shape: f32[16,128], index: 1, kind: output, shape index: {0}]   ;;  %s660_s2 = inlined_call_operand.vmem [shape: f32[16,128], index: 2, kind: output, shape index: {1}]  }
   0x1   :  { %10 = vsyncpa [#allocation5 + $0x1], 0  ;;  %s530_s9 = smov 0   ;;  %s532_s10 = smov 0  }
   0x2   :  { %s534_s11 = smov 0   ;;  %s536_s12 = smov 0  }
   0x3   :  { %s538_s13 = smov 0   ;;  %s540_s14 = smov 0  }
   0x4 LB: > { %s365_s15 = sadd.s32 4294967295, %s512_s14   ;;  %s35_s16 = sadd.s32 1, %s508_s13  ;;  %s512_s14 = sphi %s540_s14, %s16_s14   ;;  %s508_s13 = sphi %s538_s13, %s670_s13   ;;  %s504_s12 = sphi %s536_s12, %s669_s12   ;;  %s500_s11 = sphi %s534_s11, %s668_s11   ;;  %s496_s10 = sphi %s532_s10, %s667_s10   ;;  %s492_s9 = sphi %s530_s9, %s666_s9  }
   0x5   : > { %p37_p0 = scmp.ge.s32.totalorder %s35_s16, 2  ;;  %s46_s17 = sadd.s32 1, %s500_s11 }
   0x6   : > { %p53_p1 = scmp.ne.s32.totalorder %s500_s11, %s496_s10  ;;  %p54_p2 = scmp.eq.s32.totalorder %s512_s14, 0 }
   0x7   : > { %s672_s16 = smov (%p37_p0, %s35_s16), 0  ;;  %p59_p4 = scmp.ne.s32.totalorder %s496_s10, %s492_s9 }
   0x8   : > { %p566_p3 = por %p54_p2, %p53_p1  ;;  %s41_s19 = ssub.s32 %s508_s13, %s672_s16 }
   0x9   : > { %p60_p5 = scmp.eq.s32.totalorder %s365_s15, 0  ;;  %p44_p6 = scmp.eq.s32.totalorder %s41_s19, 0 }
   0xa   : > { %p383_p8 = scmp.lt.s32.totalorder %s512_s14, 2  ;;  %s139_s22 = sand.u32 1, %s500_s11  }
   0xb   : > { %p573_p7 = por %p60_p5, %p59_p4  ;;  %s370_s23 = sshll.u32 %s508_s13, 7 }
   0xc   : > { %s579_s21 = scalar_select %p44_p6, %s500_s11, %s46_s17  }
   0xd   : > { %s369_s24 = sshll.u32 %s139_s22, 3  ;;  %s586_s27 = scalar_lea.hbm %s658_s0, %s370_s23 }
   0xe   : > { %s143_s28 = scalar_lea.vmem [#allocation4], %s369_s24  ;;  %p590_p9 = pnand %p383_p8, %p566_p3 }
   0xf   : > { %s152_s29 = sshll.u32 %s143_s28, 4  ;;  %s140_s3 = scalar_lea.sflag [#allocation5], %s139_s22  ;;  %s594_s29 = int_to_ptr.vmem [resolvable:$true] %s152_s29 }
  0x10   : > { %s432_s4 = scalar_lea.hbm %s586_s27, 128  ;;  %p434_p13 = pneg %p590_p9 }
  0x11   : > { %p433_p12 = scmp.ne.s32.totalorder %s586_s27, %s432_s4  ;;  %s437_s7 = scalar_lea.hbm %s658_s0, 256 }
  0x12   : > { %p438_p2 = scmp.lt.u32.totalorder %s586_s27, %s658_s0  ;;  %p439_p3 = scmp.lt.u32.totalorder %s437_s7, %s432_s4 }
  0x13   : > { %p435_p0 = pnand %p434_p13, %p433_p12  ;;  %p441_p5 = scmp.lt.u32.totalorder %s432_s4, %s586_s27 }
  0x14   : > { %p440_p4 = por %p439_p3, %p438_p2 }
  0x15   : > { %p436_p1 = pneg %p435_p0 }
  0x16   : > { %p442_p6 = por %p441_p5, %p440_p4 }
  0x18   : > { %p443_p8 = pnand %p442_p6, %p436_p1 }
  0x1a   : > { %446 = shalt.err (!%p443_p8)
}
  0x1b   : > { %s447_s15 = scalar_lea.vmem %s594_s29, 128  ;;  %s514_s17 = smov [#allocation4]  }
  0x1c   : > { %p448_p12 = scmp.ne.s32.totalorder %s594_s29, %s447_s15  ;;  %s452_s18 = sshll.u32 %s514_s17, 4  ;;  %s453_s18 = int_to_ptr.vmem [resolvable:$false] %s452_s18 }
  0x1d   : > { %s454_s19 = scalar_lea.vmem %s453_s18, 256  ;;  %p455_p11 = scmp.lt.s32.totalorder %s594_s29, %s453_s18 }
  0x1e   : > { %p450_p0 = pnand %p448_p12, %p434_p13  ;;  %p456_p2 = scmp.lt.s32.totalorder %s454_s19, %s447_s15 }
  0x20   : > { %p451_p10 = pneg %p450_p0  ;;  %p457_p3 = por %p456_p2, %p455_p11 }
  0x22   : > { %p458_p4 = pnand %p457_p3, %p451_p10 }
  0x24   : > { %461 = shalt.err (!%p458_p4)
}
  0x25   : > { %382 = dma.hbm_to_vmem [thread:$0]  (!%p590_p9), %s586_s27, 128, %s594_s29, %s140_s3  }
  0x26   : > { %p664_p1 = scmp.lt.s32.totalorder %s512_s14, 3  ;;  %p665_p5 = scmp.ge.s32.totalorder %s512_s14, 1 }
  0x28   : > { %p158_p13 = pnand %p665_p5, %p664_p1 }
  0x29   : > { %s163_s22 = sand.u32 (!%p158_p13), 1, %s496_s10  }
  0x2a   : > { %161 = sbr.rel (%p158_p13) target bundleno = 198 (0xc6), region = 24  ;;  %s372_s23 = sshll.u32 (!%p158_p13), %s163_s22, 3 }
  0x2b   : > { %s164_s24 = scalar_lea.sflag (!%p158_p13), [#allocation5], %s163_s22  ;;  %s167_s25 = scalar_lea.vmem (!%p158_p13), [#allocation4], %s372_s23 }
  0x31   : > { %487 = dma.done.wait (%p573_p7), %s164_s24, 128  }
  0x32   : > { %489 = vsyncadd (%p573_p7), %s164_s24, 4294967168  ;;  %v220_v0 = vld [vmem:[%s167_s25] sm:$0xff]  ;;  %p198_p9 = scmp.lt.s32.totalorder %s504_s12, 1 }
  0x33   : > { %229 = vmin.xlane.f32.xlu0 %v220_v0 }
  0x34   : > { %s674_s12 = smov (!%p198_p9, %s504_s12), 1 }
  0x35   : > { %s373_s26 = sshll.u32 %s674_s12, 3 }
  0x36   : > { %s204_s29 = scalar_lea.vmem %s659_s1, %s373_s26  ;;  %s211_s4 = scalar_lea.vmem %s660_s2, %s373_s26 }
  0x37   : > { %232 = vmax.xlane.f32.xlu0 %v220_v0 }
  0xc0   : > { %v230_v1 = vpop.xlane.xlu0 %229 }
  0xc1   : > { %234 = vst [vmem:[%s204_s29] sm:$0xff] %v230_v1 }
  0xc4   : > { %v233_v2 = vpop.xlane.xlu0 %232 }
  0xc5   : > { %235 = vst [vmem:[%s211_s4] sm:$0xff] %v233_v2 }
  0xc6 PF: > { %s16_s14 = sadd.s32 1, %s512_s14   ;;  %s666_s9 = smov %s496_s10 }
  0xc7   : > { %p13_p7 = scmp.ge.s32.totalorder %s16_s14, 4   ;;  %s667_s10 = smov %s500_s11 }
  0xc8   : > { %s668_s11 = smov %s579_s21  ;;  %s669_s12 = smov %s508_s13 }
  0xc9   : > { %s670_s13 = smov %s672_s16  ;;  %15 = sbr.rel (!%p13_p7) target bundleno = 4 (0x4), region = 84 }
  0xd0   :  { %281 = vsyncpa [#allocation5], 1 }
  0xd1   :  { %283 = vsyncpa [#allocation5 + $0x1], 1 }

</bundles_post_ra>
